<compile_context>
chip_gen: v7x
topology: tpu7x:2x2x1
jax: 0.10.0
libtpu: 0.0.40
codegen_flags: <defaults>
</compile_context>

<pallas_src>
import functools
import math

import jax
import jax.numpy as jnp
import numpy as np
from jax import lax
from jax.experimental import pallas as pl
from jax.experimental.pallas import tpu as pltpu

_NEG_BIAS = -1e9  # finite stand-in for the -inf of the materialized BlockDiagonalMask


def _round_up(x, m):
    return (x + m - 1) // m * m


def _vmem_limit_bytes(est_bytes):
    # double-buffered estimate + headroom, clamped to a value every TPU gen accepts
    return int(max(16 << 20, min(2 * est_bytes + (8 << 20), 100 << 20)))


# --------------------------------------------------------------------------- #
# Linear (x @ W^T + b) kernel: rows tiled over the grid, weights resident.
# --------------------------------------------------------------------------- #
def _linear_kernel(x_ref, w_ref, b_ref, o_ref):
    # x_ref: (tm, Cin), w_ref: (Cin, N), b_ref: (1, N), o_ref: (tm, N)
    y = jnp.dot(x_ref[...], w_ref[...], preferred_element_type=jnp.float32)
    y = y + b_ref[...]                       # (1, N) bias broadcasts over rows
    o_ref[...] = y.astype(o_ref.dtype)


def _linear_pallas(x2, w_t, b, *, tm):
    """y = x2 @ w_t + b.  x2: (M, Cin) with M % tm == 0, w_t: (Cin, N), b: (N,)."""
    M, Cin = x2.shape
    N = w_t.shape[1]
    # Lane-dense output stores: pad output width to a multiple of 128, slice after.
    N_pad = _round_up(N, 128)
    if N_pad != N:
        w_t = jnp.pad(w_t, ((0, 0), (0, N_pad - N)))
        b = jnp.pad(b, (0, N_pad - N))
    b2 = b.reshape(1, N_pad)

    itemsize = x2.dtype.itemsize
    est = itemsize * (tm * Cin + tm * N_pad + Cin * N_pad + N_pad)

    out = pl.pallas_call(
        _linear_kernel,
        out_shape=jax.ShapeDtypeStruct((M, N_pad), x2.dtype),
        grid=(M // tm,),
        in_specs=[
            pl.BlockSpec((tm, Cin), lambda i: (i, 0)),      # activations, row-tiled
            pl.BlockSpec((Cin, N_pad), lambda i: (0, 0)),   # resident weight
            pl.BlockSpec((1, N_pad), lambda i: (0, 0)),     # resident bias
        ],
        out_specs=pl.BlockSpec((tm, N_pad), lambda i: (i, 0)),
        compiler_params=pltpu.CompilerParams(
            dimension_semantics=("parallel",),
            vmem_limit_bytes=_vmem_limit_bytes(est),
        ),
    )(x2, w_t, b2)
    return out[:, :N] if N_pad != N else out


# --------------------------------------------------------------------------- #
# Flash-attention kernel with additive (block-diagonal) bias.
# --------------------------------------------------------------------------- #
def _attn_kernel(q_ref, k_ref, v_ref, bias_ref, o_ref, m_sc, l_sc, acc_sc, *, scale):
    kv = pl.program_id(2)

    @pl.when(kv == 0)
    def _():
        m_sc[...] = jnp.full_like(m_sc, -jnp.inf)
        l_sc[...] = jnp.zeros_like(l_sc)
        acc_sc[...] = jnp.zeros_like(acc_sc)

    q = q_ref[...]                                           # (tq, hd)
    k = k_ref[...]                                           # (tk, hd)
    s = lax.dot_general(q, k, (((1,), (1,)), ((), ())),
                        preferred_element_type=jnp.float32)  # (tq, tk)
    s = s * scale + bias_ref[...]

    m_prev = m_sc[...]
    m_new = jnp.maximum(m_prev, s.max(axis=-1, keepdims=True))
    alpha = jnp.exp(m_prev - m_new)
    p = jnp.exp(s - m_new)
    l_sc[...] = alpha * l_sc[...] + p.sum(axis=-1, keepdims=True)
    acc_sc[...] = alpha * acc_sc[...] + jnp.dot(
        p.astype(v_ref.dtype), v_ref[...], preferred_element_type=jnp.float32)
    m_sc[...] = m_new

    @pl.when(kv == pl.num_programs(2) - 1)
    def _():
        o_ref[...] = (acc_sc[...] *
                      pl.reciprocal(l_sc[...], approx=False)).astype(o_ref.dtype)


def _attention_pallas(q, k, v, bias, *, tq, tk, scale):
    """q, k, v: (n_head, T_pad, hd); bias: (T_pad, T_pad) additive f32 mask."""
    H, T_pad, hd = q.shape
    itemsize = q.dtype.itemsize
    est = itemsize * (tq * hd + 2 * tk * hd + tq * hd) + 4 * (tq * tk + tq * hd + 2 * tq)
    kernel = functools.partial(_attn_kernel, scale=scale)
    return pl.pallas_call(
        kernel,
        out_shape=jax.ShapeDtypeStruct((H, T_pad, hd), q.dtype),
        grid=(H, T_pad // tq, T_pad // tk),
        in_specs=[
            pl.BlockSpec((None, tq, hd), lambda h, qi, ki: (h, qi, 0)),
            pl.BlockSpec((None, tk, hd), lambda h, qi, ki: (h, ki, 0)),
            pl.BlockSpec((None, tk, hd), lambda h, qi, ki: (h, ki, 0)),
            pl.BlockSpec((tq, tk), lambda h, qi, ki: (qi, ki)),
        ],
        out_specs=pl.BlockSpec((None, tq, hd), lambda h, qi, ki: (h, qi, 0)),
        scratch_shapes=[
            pltpu.VMEM((tq, 1), jnp.float32),    # running max
            pltpu.VMEM((tq, 1), jnp.float32),    # running denominator
            pltpu.VMEM((tq, hd), jnp.float32),   # running numerator
        ],
        compiler_params=pltpu.CompilerParams(
            dimension_semantics=("parallel", "parallel", "arbitrary"),
            vmem_limit_bytes=_vmem_limit_bytes(est),
        ),
    )(q, k, v, bias)


# --------------------------------------------------------------------------- #
# Block-diagonal additive bias (xformers BlockDiagonalMask materialized).
# --------------------------------------------------------------------------- #
def _block_diagonal_bias(seqlens, T, T_pad, dtype=jnp.float32):
    seg = np.full((T_pad,), -1, dtype=np.int32)
    start = 0
    for i, L in enumerate(seqlens):
        seg[start:start + L] = i
        start += L
    assert start == T, "sum(seqlens) must equal T"
    seg = jnp.asarray(seg)
    valid = seg >= 0
    same = (seg[:, None] == seg[None, :]) & valid[:, None] & valid[None, :]
    return jnp.where(same, 0.0, _NEG_BIAS).astype(dtype)


# --------------------------------------------------------------------------- #
# Full module forward (eval mode, rope disabled).
# --------------------------------------------------------------------------- #
def self_attention_pallas(features, coords, seqlens, w_in, b_in, w_out, b_out,
                          n_head, *, tm=256, tq=128, tk=128):
    """features: (1, T, C); coords: (1, T, 2) (unused, RoPE not implemented);
    seqlens: per-segment lengths of the BlockDiagonalMask;
    w_in: (3C, C), b_in: (3C,), w_out: (C, C), b_out: (C,)  [nn.Linear layout].
    On v5e prefer tm=128 (4x128^2 MXU); pass bf16 tensors on v6e/v7x for peak MXU."""
    del coords  # TODO(synk): RoPE (rope=True) not implemented.
    B, T, C = features.shape
    assert B == 1, "module operates on a packed batch of shape (1, T, C)"
    assert C % n_head == 0
    hd = C // n_head
    scale = 1.0 / math.sqrt(hd)

    # Pad T so every grid uses full, aligned tiles (no M % tm asserts).
    T_pad = _round_up(T, math.lcm(tm, tq, tk))
    x = jnp.pad(features[0], ((0, T_pad - T), (0, 0)))                 # (T_pad, C)

    # --- fused QKV projection ------------------------------------------------
    qkv = _linear_pallas(x, jnp.transpose(w_in), b_in, tm=tm)          # (T_pad, 3C)
    q, k, v = jnp.split(qkv, 3, axis=-1)

    def heads(t):                                                      # -> (H, T_pad, hd)
        return t.reshape(T_pad, n_head, hd).transpose(1, 0, 2)

    q, k, v = heads(q), heads(k), heads(v)

    # --- flash attention with block-diagonal mask ----------------------------
    bias = _block_diagonal_bias(seqlens, T, T_pad, dtype=jnp.float32)
    o = _attention_pallas(q, k, v, bias, tq=tq, tk=tk, scale=scale)
    o = o.transpose(1, 0, 2).reshape(T_pad, C)

    # --- output projection (+ identity resid_dropout in eval mode) -----------
    y = _linear_pallas(o, jnp.transpose(w_out), b_out, tm=tm)          # (T_pad, C)

    return y[:T].reshape(1, T, C)


# --------------------------------------------------------------------------- #
# Pure-JAX reference matching the PyTorch forward (eval mode, rope=False).
# --------------------------------------------------------------------------- #
def self_attention_reference(features, seqlens, w_in, b_in, w_out, b_out, n_head):
    B, T, C = features.shape
    hd = C // n_head
    x = features[0]
    qkv = x @ w_in.T + b_in
    q, k, v = jnp.split(qkv, 3, axis=-1)
    q = q.reshape(T, n_head, hd).transpose(1, 0, 2)
    k = k.reshape(T, n_head, hd).transpose(1, 0, 2)
    v = v.reshape(T, n_head, hd).transpose(1, 0, 2)
    bias = _block_diagonal_bias(seqlens, T, T)
    s = jnp.einsum("hqd,hkd->hqk", q, k) / math.sqrt(hd) + bias[None]
    p = jax.nn.softmax(s, axis=-1)
    o = jnp.einsum("hqk,hkd->hqd", p, v)
    o = o.transpose(1, 0, 2).reshape(T, C)
    return (o @ w_out.T + b_out)[None]


if __name__ == "__main__":
    # Small shapes consistent with the module: one packed batch of two segments.
    B, T, C, n_head = 1, 200, 32, 4
    seqlens = (120, 80)

    key = jax.random.PRNGKey(0)
    kx, kc, k1, k2, k3, k4 = jax.random.split(key, 6)
    features = jax.random.normal(kx, (B, T, C), dtype=jnp.float32)
    coords = jax.random.normal(kc, (B, T, 2), dtype=jnp.float32)   # unused (rope=False)
    w_in = jax.random.normal(k1, (3 * C, C), dtype=jnp.float32) * (1.0 / math.sqrt(C))
    b_in = jax.random.normal(k2, (3 * C,), dtype=jnp.float32) * 0.01
    w_out = jax.random.normal(k3, (C, C), dtype=jnp.float32) * (1.0 / math.sqrt(C))
    b_out = jax.random.normal(k4, (C,), dtype=jnp.float32) * 0.01

    out = self_attention_pallas(features, coords, seqlens,
                                w_in, b_in, w_out, b_out, n_head)
    out = jax.block_until_ready(out)

    ref = self_attention_reference(features, seqlens, w_in, b_in, w_out, b_out, n_head)
    assert out.shape == (B, T, C)
    err = float(jnp.max(jnp.abs(out - ref)))
    assert jnp.allclose(out, ref, atol=1e-3, rtol=1e-3), f"max abs err = {err}"

    print("KERNEL_OK")
</pallas_src>

<mosaic_0001>
module attributes {stable_mosaic.version = 11 : i64} {
  func.func @_linear_kernel(%arg0: i32, %arg1: memref<256x32xf32, #tpu.memory_space<vmem>>, %arg2: memref<32x128xf32, #tpu.memory_space<vmem>>, %arg3: memref<1x128xf32, #tpu.memory_space<vmem>>, %arg4: memref<256x128xf32, #tpu.memory_space<vmem>>) attributes {dimension_semantics = [#tpu.dimension_semantics<parallel>], iteration_bounds = array<i64: 1>, scalar_prefetch = 0 : i64, scratch_operands = 0 : i64, tpu.core_type = #tpu.core_type<tc>, window_params = [{transform_indices = @transform_0, window_bounds = array<i64: 256, 32>}, {pipeline_mode = #tpu.pipeline_mode<synchronous>, transform_indices = @transform_1, window_bounds = array<i64: 32, 128>}, {pipeline_mode = #tpu.pipeline_mode<synchronous>, transform_indices = @transform_2, window_bounds = array<i64: 1, 128>}, {transform_indices = @transform_3, window_bounds = array<i64: 256, 128>}]} {
    %c0 = arith.constant 0 : index
    %c0_0 = arith.constant 0 : index
    %0 = vector.load %arg1[%c0, %c0_0] : memref<256x32xf32, #tpu.memory_space<vmem>>, vector<256x32xf32>
    %c0_1 = arith.constant 0 : index
    %c0_2 = arith.constant 0 : index
    %1 = vector.load %arg2[%c0_1, %c0_2] : memref<32x128xf32, #tpu.memory_space<vmem>>, vector<32x128xf32>
    %cst = arith.constant dense<0.000000e+00> : vector<256x128xf32>
    %2 = tpu.matmul %0, %1, %cst {dimension_numbers = #tpu.dot_dimension_numbers<[1], [0], [0], [1], [0, 0, 1, 1], [], []>} : vector<256x32xf32>, vector<32x128xf32>, vector<256x128xf32> -> vector<256x128xf32>
    %c0_3 = arith.constant 0 : index
    %c0_4 = arith.constant 0 : index
    %3 = vector.load %arg3[%c0_3, %c0_4] : memref<1x128xf32, #tpu.memory_space<vmem>>, vector<1x128xf32>
    %4 = vector.broadcast %3 : vector<1x128xf32> to vector<256x128xf32>
    %5 = arith.addf %2, %4 : vector<256x128xf32>
    %c0_5 = arith.constant 0 : index
    %c0_6 = arith.constant 0 : index
    %6 = vector.load %arg4[%c0_5, %c0_6] : memref<256x128xf32, #tpu.memory_space<vmem>>, vector<256x128xf32>
    tpu.vector_store %arg4[%c0_5, %c0_6], %5 {strides = array<i32>} : memref<256x128xf32, #tpu.memory_space<vmem>>, vector<256x128xf32>,
    return
  }
  func.func @transform_0(%arg0: i32) -> (i32, i32) {
    %c0_i32 = arith.constant 0 : i32
    %c0_i32_0 = arith.constant 0 : i32
    return %arg0, %c0_i32 : i32, i32
  }
  func.func @transform_1(%arg0: i32) -> (i32, i32) {
    %c0_i32 = arith.constant 0 : i32
    %c0_i32_0 = arith.constant 0 : i32
    %c0_i32_1 = arith.constant 0 : i32
    return %c0_i32, %c0_i32_0 : i32, i32
  }
  func.func @transform_2(%arg0: i32) -> (i32, i32) {
    %c0_i32 = arith.constant 0 : i32
    %c0_i32_0 = arith.constant 0 : i32
    %c0_i32_1 = arith.constant 0 : i32
    return %c0_i32, %c0_i32_0 : i32, i32
  }
  func.func @transform_3(%arg0: i32) -> (i32, i32) {
    %c0_i32 = arith.constant 0 : i32
    %c0_i32_0 = arith.constant 0 : i32
    return %arg0, %c0_i32 : i32, i32
  }
}

</mosaic_0001>

<bundles_post_ra>
// kernel: tpu_custom_call.1
= control target key start
LH: loop header
LB: loop body
LE: loop exit
PB: predicated region body
PF: predicated region fallthrough
CT: control target
= control target key end

     0   :  { %vm58_vm0 = vcmask 261120   ;;  %s804_s0 = inlined_call_operand.vmem [shape: f32[256,32], index: 0, kind: input, shape index: {}]   ;;  %s805_s1 = inlined_call_operand.vmem [shape: f32[32,128], index: 1, kind: input, shape index: {}]   ;;  %s806_s2 = inlined_call_operand.vmem [shape: f32[1,128], index: 2, kind: input, shape index: {}]   ;;  %s807_s3 = inlined_call_operand.hbm [shape: f32[256,128], index: 3, kind: output, shape index: {}]  }
   0x1   :  { %v47_v0 = vld [vmem:[%s805_s1] sm:$0xff]  ;;  %v48_v1 = vld [vmem:[%s805_s1 + $0x8] sm:$0xff]  ;;  %v49_v2 = vld [vmem:[%s805_s1 + $0x10] sm:$0xff] }
   0x2   :  { %v553_v3 = vpack.c.bf16 %v48_v1, %v47_v0  ;;  %v50_v4 = vld [vmem:[%s805_s1 + $0x18] sm:$0xff]  ;;  %v15_v5 = vld [vmem:[%s804_s0] sm:$0xff]  ;;  %v16_v8 = vld [vmem:[%s804_s0 + $0x8] sm:$0xff] }
   0x3   :  { %v31_v6 = vld [vmem:[%s804_s0 + $0x80] sm:$0xff]  ;;  %v557_v7 = vpack.c.bf16 %v50_v4, %v49_v2  ;;  %505 = vmatprep.mubr.msk.f32.mxu0 %vm58_vm0, %v15_v5  ;;  %v32_v9 = vld [vmem:[%s804_s0 + $0x88] sm:$0xff]  ;;  %v17_v10 = vld [vmem:[%s804_s0 + $0x10] sm:$0xff] }
   0x4   :  { %529 = vmatprep.mubr.msk.f32.mxu1 %vm58_vm0, %v31_v6  ;;  %554 = vmatprep.subr.bf16.mxu0 %v553_v3  ;;  %v33_v11 = vld [vmem:[%s804_s0 + $0x90] sm:$0xff]  ;;  %v18_v12 = vld [vmem:[%s804_s0 + $0x18] sm:$0xff] }
   0x5   :  { %561 = vmatprep.subr.bf16.mxu1 %v553_v3  ;;  %556 = vmatpush3.bf16.msra.mxu0 %v553_v3  ;;  %v34_v13 = vld [vmem:[%s804_s0 + $0x98] sm:$0xff] }
   0x6   :  { %563 = vmatpush3.bf16.msra.mxu1 %v553_v3  ;;  %558 = vmatprep.subr.bf16.mxu0 %v557_v7 }
   0x7   :  { %562 = vmatprep.subr.bf16.mxu1 %v557_v7 }
   0x9   :  { %560 = vmatpush3.bf16.msra.mxu0 %v557_v7 }
   0xa   :  { %564 = vmatpush3.bf16.msra.mxu1 %v557_v7 }
   0xc   :  { %506 = vmatmul.mubr.msk.f32.vlgmr.msra.gmra.mrb[0].mxu0 %vm58_vm0, %v16_v8 }
   0xd   :  { %530 = vmatmul.mubr.msk.f32.vlgmr.msra.gmra.mrb[0].mxu1 %vm58_vm0, %v32_v9  ;;  %508 = vmatprep.mubr.msk.f32.mxu0 %vm58_vm0, %v17_v10 }
   0xe   :  { %532 = vmatprep.mubr.msk.f32.mxu1 %vm58_vm0, %v33_v11 }
   0xf   :  { %8 = vsyncpa [#allocation3], 0  ;;  %v19_v14 = vld [vmem:[%s804_s0 + $0x20] sm:$0xff]  ;;  %v20_v16 = vld [vmem:[%s804_s0 + $0x28] sm:$0xff] }
  0x10   :  { %v35_v15 = vld [vmem:[%s804_s0 + $0xa0] sm:$0xff]  ;;  %509 = vmatmul.mubr.msk.f32.gmra.mrb[2].mxu0 %vm58_vm0, %v18_v12  ;;  %v36_v17 = vld [vmem:[%s804_s0 + $0xa8] sm:$0xff]  ;;  %v21_v18 = vld [vmem:[%s804_s0 + $0x30] sm:$0xff] }
  0x11   :  { %533 = vmatmul.mubr.msk.f32.gmra.mrb[2].mxu1 %vm58_vm0, %v34_v13  ;;  %511 = vmatprep.mubr.msk.f32.mxu0 %vm58_vm0, %v19_v14  ;;  %v37_v19 = vld [vmem:[%s804_s0 + $0xb0] sm:$0xff]  ;;  %v22_v20 = vld [vmem:[%s804_s0 + $0x38] sm:$0xff]  ;;  %v23_v22 = vld [vmem:[%s804_s0 + $0x40] sm:$0xff] }
  0x12   :  { %535 = vmatprep.mubr.msk.f32.mxu1 %vm58_vm0, %v35_v15  ;;  %v38_v21 = vld [vmem:[%s804_s0 + $0xb8] sm:$0xff]  ;;  %v39_v23 = vld [vmem:[%s804_s0 + $0xc0] sm:$0xff]  ;;  %v24_v24 = vld [vmem:[%s804_s0 + $0x48] sm:$0xff] }
  0x13   :  { %v40_v25 = vld [vmem:[%s804_s0 + $0xc8] sm:$0xff]  ;;  %v25_v26 = vld [vmem:[%s804_s0 + $0x50] sm:$0xff]  ;;  %v26_v28 = vld [vmem:[%s804_s0 + $0x58] sm:$0xff] }
  0x14   :  { %512 = vmatmul.mubr.msk.f32.gmra.mrb[4].mxu0 %vm58_vm0, %v20_v16  ;;  %v41_v27 = vld [vmem:[%s804_s0 + $0xd0] sm:$0xff]  ;;  %v42_v29 = vld [vmem:[%s804_s0 + $0xd8] sm:$0xff]  ;;  %v27_v30 = vld [vmem:[%s804_s0 + $0x60] sm:$0xff] }
  0x15   :  { %536 = vmatmul.mubr.msk.f32.gmra.mrb[4].mxu1 %vm58_vm0, %v36_v17  ;;  %514 = vmatprep.mubr.msk.f32.mxu0 %vm58_vm0, %v21_v18  ;;  %v43_v31 = vld [vmem:[%s804_s0 + $0xe0] sm:$0xff]  ;;  %v28_v32 = vld [vmem:[%s804_s0 + $0x68] sm:$0xff]  ;;  %v29_v34 = vld [vmem:[%s804_s0 + $0x70] sm:$0xff] }
  0x16   :  { %538 = vmatprep.mubr.msk.f32.mxu1 %vm58_vm0, %v37_v19  ;;  %v44_v33 = vld [vmem:[%s804_s0 + $0xe8] sm:$0xff]  ;;  %v45_v35 = vld [vmem:[%s804_s0 + $0xf0] sm:$0xff]  ;;  %v30_v36 = vld [vmem:[%s804_s0 + $0x78] sm:$0xff] }
  0x17   :  { %v46_v37 = vld [vmem:[%s804_s0 + $0xf8] sm:$0xff]  ;;  %v758_v38 = vld [vmem:[%s806_s2] ss:$0 sm:$0xff]  ;;  %s592_s0 = smov [#allocation2]  }
  0x18   :  { %515 = vmatmul.mubr.msk.f32.gmra.mrb[6].mxu0 %vm58_vm0, %v22_v20  ;;  %s417_s2 = sshll.u32 %s592_s0, 4  ;;  %s418_s2 = int_to_ptr.vmem [resolvable:$true] %s417_s2 }
  0x19   :  { %539 = vmatmul.mubr.msk.f32.gmra.mrb[6].mxu1 %vm58_vm0, %v38_v21  ;;  %517 = vmatprep.mubr.msk.f32.mxu0 %vm58_vm0, %v23_v22  ;;  %s568_s29 = scalar_lea.vmem %s418_s2, 4096  ;;  %p573_p1 = scmp.lt.s32.totalorder %s418_s2, %s418_s2 }
  0x1a   :  { %541 = vmatprep.mubr.msk.f32.mxu1 %vm58_vm0, %v39_v23  ;;  %p569_p0 = scmp.ne.s32.totalorder %s418_s2, %s568_s29  ;;  %p574_p2 = scmp.lt.s32.totalorder %s568_s29, %s568_s29 }
  0x1c   :  { %518 = vmatmul.mubr.msk.f32.gmra.mrb[8].mxu0 %vm58_vm0, %v24_v24  ;;  %p575_p3 = por %p574_p2, %p573_p1 }
  0x1d   :  { %542 = vmatmul.mubr.msk.f32.gmra.mrb[8].mxu1 %vm58_vm0, %v40_v25  ;;  %520 = vmatprep.mubr.msk.f32.mxu0 %vm58_vm0, %v25_v26 }
  0x1e   :  { %544 = vmatprep.mubr.msk.f32.mxu1 %vm58_vm0, %v41_v27  ;;  %p576_p4 = pnand %p575_p3, %p569_p0 }
  0x20   :  { %521 = vmatmul.mubr.msk.f32.gmra.mrb[10].mxu0 %vm58_vm0, %v26_v28 }
  0x21   :  { %545 = vmatmul.mubr.msk.f32.gmra.mrb[10].mxu1 %vm58_vm0, %v42_v29  ;;  %523 = vmatprep.mubr.msk.f32.mxu0 %vm58_vm0, %v27_v30 }
  0x22   :  { %547 = vmatprep.mubr.msk.f32.mxu1 %vm58_vm0, %v43_v31 }
  0x24   :  { %524 = vmatmul.mubr.msk.f32.gmra.mrb[12].mxu0 %vm58_vm0, %v28_v32 }
  0x25   :  { %548 = vmatmul.mubr.msk.f32.gmra.mrb[12].mxu1 %vm58_vm0, %v44_v33  ;;  %526 = vmatprep.mubr.msk.f32.mxu0 %vm58_vm0, %v29_v34 }
  0x26   :  { %550 = vmatprep.mubr.msk.f32.mxu1 %vm58_vm0, %v45_v35 }
  0x28   :  { %527 = vmatmul.mubr.msk.f32.gmra.mrb[14].mxu0 %vm58_vm0, %v30_v36 }
  0x29   :  { %551 = vmatmul.mubr.msk.f32.gmra.mrb[14].mxu1 %vm58_vm0, %v46_v37 }
  0xdf   :  { %v507_v39 = vpop.f32.mrb[0].mxu0 }
  0xe0   :  { %v531_v40 = vpop.f32.mrb[0].mxu1  ;;  %v227_v41 = vadd.f32 %v507_v39, %v758_v38  ;;  %v221_v43 = vpop.f32.mrb[1].mxu0 }
  0xe1   :  { %v307_v42 = vadd.f32 %v531_v40, %v758_v38  ;;  %v301_v44 = vpop.f32.mrb[1].mxu1  ;;  %v222_v45 = vadd.f32 %v758_v38, %v221_v43 }
  0xe2   :  { %v302_v46 = vadd.f32 %v758_v38, %v301_v44  ;;  %381 = vst [vmem:[#allocation2 + $0x8] sm:$0xff] %v227_v41 }
  0xe3   :  { %397 = vst [vmem:[#allocation2 + $0x88] sm:$0xff] %v307_v42  ;;  %380 = vst [vmem:[#allocation2] sm:$0xff] %v222_v45  ;;  %v510_v47 = vpop.f32.mrb[2].mxu0 }
  0xe4   :  { %396 = vst [vmem:[#allocation2 + $0x80] sm:$0xff] %v302_v46  ;;  %v534_v48 = vpop.f32.mrb[2].mxu1  ;;  %v237_v49 = vadd.f32 %v510_v47, %v758_v38  ;;  %v231_v51 = vpop.f32.mrb[3].mxu0 }
  0xe5   :  { %v317_v50 = vadd.f32 %v534_v48, %v758_v38  ;;  %v311_v52 = vpop.f32.mrb[3].mxu1  ;;  %v232_v53 = vadd.f32 %v758_v38, %v231_v51 }
  0xe6   :  { %v312_v54 = vadd.f32 %v758_v38, %v311_v52  ;;  %383 = vst [vmem:[#allocation2 + $0x18] sm:$0xff] %v237_v49 }
  0xe7   :  { %399 = vst [vmem:[#allocation2 + $0x98] sm:$0xff] %v317_v50  ;;  %382 = vst [vmem:[#allocation2 + $0x10] sm:$0xff] %v232_v53  ;;  %v513_v55 = vpop.f32.mrb[4].mxu0 }
  0xe8   :  { %398 = vst [vmem:[#allocation2 + $0x90] sm:$0xff] %v312_v54  ;;  %v537_v56 = vpop.f32.mrb[4].mxu1  ;;  %v247_v57 = vadd.f32 %v513_v55, %v758_v38  ;;  %v241_v59 = vpop.f32.mrb[5].mxu0 }
  0xe9   :  { %v327_v58 = vadd.f32 %v537_v56, %v758_v38  ;;  %v321_v60 = vpop.f32.mrb[5].mxu1  ;;  %v242_v61 = vadd.f32 %v758_v38, %v241_v59 }
  0xea   :  { %v322_v62 = vadd.f32 %v758_v38, %v321_v60  ;;  %385 = vst [vmem:[#allocation2 + $0x28] sm:$0xff] %v247_v57 }
  0xeb   :  { %401 = vst [vmem:[#allocation2 + $0xa8] sm:$0xff] %v327_v58  ;;  %384 = vst [vmem:[#allocation2 + $0x20] sm:$0xff] %v242_v61  ;;  %v516_v63 = vpop.f32.mrb[6].mxu0 }
  0xec   :  { %400 = vst [vmem:[#allocation2 + $0xa0] sm:$0xff] %v322_v62  ;;  %v540_v0 = vpop.f32.mrb[6].mxu1  ;;  %v257_v1 = vadd.f32 %v516_v63, %v758_v38  ;;  %v251_v3 = vpop.f32.mrb[7].mxu0 }
  0xed   :  { %v337_v2 = vadd.f32 %v540_v0, %v758_v38  ;;  %v331_v4 = vpop.f32.mrb[7].mxu1  ;;  %v252_v5 = vadd.f32 %v758_v38, %v251_v3 }
  0xee   :  { %v332_v6 = vadd.f32 %v758_v38, %v331_v4  ;;  %387 = vst [vmem:[#allocation2 + $0x38] sm:$0xff] %v257_v1 }
  0xef   :  { %403 = vst [vmem:[#allocation2 + $0xb8] sm:$0xff] %v337_v2  ;;  %386 = vst [vmem:[#allocation2 + $0x30] sm:$0xff] %v252_v5  ;;  %v519_v7 = vpop.f32.mrb[8].mxu0 }
  0xf0   :  { %402 = vst [vmem:[#allocation2 + $0xb0] sm:$0xff] %v332_v6  ;;  %v543_v8 = vpop.f32.mrb[8].mxu1  ;;  %v267_v9 = vadd.f32 %v519_v7, %v758_v38  ;;  %v261_v11 = vpop.f32.mrb[9].mxu0 }
  0xf1   :  { %v347_v10 = vadd.f32 %v543_v8, %v758_v38  ;;  %v341_v12 = vpop.f32.mrb[9].mxu1  ;;  %v262_v13 = vadd.f32 %v758_v38, %v261_v11 }
  0xf2   :  { %v342_v14 = vadd.f32 %v758_v38, %v341_v12  ;;  %389 = vst [vmem:[#allocation2 + $0x48] sm:$0xff] %v267_v9 }
  0xf3   :  { %405 = vst [vmem:[#allocation2 + $0xc8] sm:$0xff] %v347_v10  ;;  %388 = vst [vmem:[#allocation2 + $0x40] sm:$0xff] %v262_v13  ;;  %v522_v15 = vpop.f32.mrb[10].mxu0 }
  0xf4   :  { %404 = vst [vmem:[#allocation2 + $0xc0] sm:$0xff] %v342_v14  ;;  %v546_v16 = vpop.f32.mrb[10].mxu1  ;;  %v277_v17 = vadd.f32 %v522_v15, %v758_v38  ;;  %v271_v19 = vpop.f32.mrb[11].mxu0 }
  0xf5   :  { %v357_v18 = vadd.f32 %v546_v16, %v758_v38  ;;  %v351_v20 = vpop.f32.mrb[11].mxu1  ;;  %v272_v21 = vadd.f32 %v758_v38, %v271_v19 }
  0xf6   :  { %v352_v22 = vadd.f32 %v758_v38, %v351_v20  ;;  %391 = vst [vmem:[#allocation2 + $0x58] sm:$0xff] %v277_v17 }
  0xf7   :  { %407 = vst [vmem:[#allocation2 + $0xd8] sm:$0xff] %v357_v18  ;;  %390 = vst [vmem:[#allocation2 + $0x50] sm:$0xff] %v272_v21  ;;  %v525_v23 = vpop.f32.mrb[12].mxu0 }
  0xf8   :  { %406 = vst [vmem:[#allocation2 + $0xd0] sm:$0xff] %v352_v22  ;;  %v549_v24 = vpop.f32.mrb[12].mxu1  ;;  %v287_v25 = vadd.f32 %v525_v23, %v758_v38  ;;  %v281_v27 = vpop.f32.mrb[13].mxu0 }
  0xf9   :  { %v367_v26 = vadd.f32 %v549_v24, %v758_v38  ;;  %v361_v28 = vpop.f32.mrb[13].mxu1  ;;  %v282_v29 = vadd.f32 %v758_v38, %v281_v27 }
  0xfa   :  { %v362_v30 = vadd.f32 %v758_v38, %v361_v28  ;;  %393 = vst [vmem:[#allocation2 + $0x68] sm:$0xff] %v287_v25 }
  0xfb   :  { %409 = vst [vmem:[#allocation2 + $0xe8] sm:$0xff] %v367_v26  ;;  %392 = vst [vmem:[#allocation2 + $0x60] sm:$0xff] %v282_v29  ;;  %v528_v31 = vpop.f32.mrb[14].mxu0 }
  0xfc   :  { %408 = vst [vmem:[#allocation2 + $0xe0] sm:$0xff] %v362_v30  ;;  %v552_v32 = vpop.f32.mrb[14].mxu1  ;;  %v297_v33 = vadd.f32 %v528_v31, %v758_v38  ;;  %v291_v35 = vpop.f32.mrb[15].mxu0 }
  0xfd   :  { %v377_v34 = vadd.f32 %v552_v32, %v758_v38  ;;  %v371_v36 = vpop.f32.mrb[15].mxu1  ;;  %v292_v37 = vadd.f32 %v758_v38, %v291_v35 }
  0xfe   :  { %v372_v39 = vadd.f32 %v758_v38, %v371_v36  ;;  %395 = vst [vmem:[#allocation2 + $0x78] sm:$0xff] %v297_v33 }
  0xff   :  { %411 = vst [vmem:[#allocation2 + $0xf8] sm:$0xff] %v377_v34  ;;  %394 = vst [vmem:[#allocation2 + $0x70] sm:$0xff] %v292_v37 }
 0x100   :  { %410 = vst [vmem:[#allocation2 + $0xf0] sm:$0xff] %v372_v39 }
 0x101   :  { %579 = shalt.err (!%p576_p4)
}
 0x102   :  { %s580_s5 = scalar_lea.hbm %s807_s3, 4096 }
 0x103   :  { %p581_p5 = scmp.ne.s32.totalorder %s807_s3, %s580_s5  ;;  %p584_p6 = scmp.lt.u32.totalorder %s580_s5, %s807_s3 }
 0x105   :  { %p586_p7 = pnand %p584_p6, %p581_p5 }
 0x107   :  { %589 = shalt.err (!%p586_p7)
}
 0x108   :  { %s593_s10 = smov 128   ;;  %s594_s11 = smov 8  }
 0x109   :  { %423 = dma.vmem_to_hbm [thread:$0]  %s418_s2, 4096, %s807_s3, [#allocation3], %s593_s10, %s593_s10, %s594_s11  }
 0x10a   :  { %590 = dma.done.wait [#allocation3], 4096  }
 0x10b   :  { %591 = vsyncadd [#allocation3], 4294963200 }
 0x10c   :  { %427 = vsyncpa [#allocation3], 1 }

</bundles_post_ra>
